<compile_context>
chip_gen: v7x
topology: tpu7x:2x2x1
jax: 0.10.0
libtpu: 0.0.40
codegen_flags: <defaults>
</compile_context>

<pallas_src>
import jax
import jax.numpy as jnp
from jax.experimental import pallas as pl
from jax.experimental.pallas import tpu as pltpu

MAX_PLANES = 5
ACTION_DIM = 13 * MAX_PLANES   # 65
STATE_DIM = 6 * MAX_PLANES     # 30
HIDDEN = 256
OUT_PAD = 128                  # lane-dense output width (65 padded to 128)
BIAS_ROWS = 8                  # sublane-padded bias pack; rows 0..2 used


def _round_up(n, m):
    return ((n + m - 1) // m) * m


def dqn_kernel(x_ref, w1_ref, w2_ref, w3_ref, b_ref, o_ref):
    # fc1 + relu : bf16 operands on the MXU, f32 accumulation
    x = x_ref[...].astype(jnp.bfloat16)
    h1 = jnp.dot(x, w1_ref[...], preferred_element_type=jnp.float32)
    h1 = jnp.maximum(h1 + b_ref[0:1, :], 0.0)
    # fc2 + relu
    h2 = jnp.dot(h1.astype(jnp.bfloat16), w2_ref[...],
                 preferred_element_type=jnp.float32)
    h2 = jnp.maximum(h2 + b_ref[1:2, :], 0.0)
    # fc3 (no activation); full 128-lane tile store (no masked partial lanes)
    out = jnp.dot(h2.astype(jnp.bfloat16), w3_ref[...],
                  preferred_element_type=jnp.float32)
    o_ref[...] = (out + b_ref[2:3, 0:OUT_PAD]).astype(o_ref.dtype)


def dqn_forward(x, w1_bf, w2_bf, w3_bf, bias_pack, *, block_b=1024,
                out_dtype=jnp.float32, trim_output=True):
    """x: (B, STATE_DIM) f32; weights bf16 in (in, out) layout (w3 padded to OUT_PAD);
    bias_pack: (BIAS_ROWS, HIDDEN) f32 with rows 0/1/2 = b1/b2/b3(zero-padded).

    out_dtype=jnp.bfloat16 halves the dominant output HBM stream on v6e/v7x.
    trim_output=False returns the lane-dense (B, OUT_PAD) buffer (no slice copy).
    """
    B = x.shape[0]
    # Batch tile: multiple of 8 sublanes, capped at block_b. No input padding:
    # Pallas handles the ragged last block (masked output stores).
    tb = min(block_b, _round_up(B, 8))
    if B > 8:
        # Guarantee >= 2 grid steps so the "parallel" batch axis can shard
        # across both v7x TensorCores (harmless on single-TC chips).
        tb = min(tb, _round_up(pl.cdiv(B, 2), 8))
    grid = (pl.cdiv(B, tb),)

    out_bytes = jnp.dtype(out_dtype).itemsize
    flops = 2 * B * (STATE_DIM * HIDDEN + HIDDEN * HIDDEN + HIDDEN * OUT_PAD)
    bytes_accessed = (x.size * x.dtype.itemsize
                      + (w1_bf.size + w2_bf.size + w3_bf.size) * 2
                      + bias_pack.size * 4
                      + B * OUT_PAD * out_bytes)

    out = pl.pallas_call(
        dqn_kernel,
        out_shape=jax.ShapeDtypeStruct((B, OUT_PAD), out_dtype),
        grid_spec=pltpu.PrefetchScalarGridSpec(
            num_scalar_prefetch=0,
            grid=grid,
            in_specs=[
                pl.BlockSpec((tb, STATE_DIM), lambda i: (i, 0)),       # x tile
                pl.BlockSpec((STATE_DIM, HIDDEN), lambda i: (0, 0)),   # w1 resident
                pl.BlockSpec((HIDDEN, HIDDEN), lambda i: (0, 0)),      # w2 resident
                pl.BlockSpec((HIDDEN, OUT_PAD), lambda i: (0, 0)),     # w3 resident
                pl.BlockSpec((BIAS_ROWS, HIDDEN), lambda i: (0, 0)),   # biases
            ],
            out_specs=pl.BlockSpec((tb, OUT_PAD), lambda i: (i, 0)),
        ),
        compiler_params=pltpu.CompilerParams(
            dimension_semantics=("parallel",)),
        cost_estimate=pl.CostEstimate(
            flops=flops, transcendentals=0, bytes_accessed=bytes_accessed),
    )(x, w1_bf, w2_bf, w3_bf, bias_pack)
    if trim_output:
        return out[:, :ACTION_DIM]
    return out


def init_linear_params(key, in_features, out_features):
    """PyTorch nn.Linear-style uniform(+/-1/sqrt(fan_in)); weight returned (in, out)."""
    kw, kb = jax.random.split(key)
    bound = 1.0 / jnp.sqrt(jnp.float32(in_features))
    w = jax.random.uniform(kw, (out_features, in_features), jnp.float32, -bound, bound)
    b = jax.random.uniform(kb, (out_features,), jnp.float32, -bound, bound)
    return w.T, b


def pack_params(w1, b1, w2, b2, w3, b3):
    w1_bf = w1.astype(jnp.bfloat16)
    w2_bf = w2.astype(jnp.bfloat16)
    w3_bf = jnp.zeros((HIDDEN, OUT_PAD), jnp.bfloat16)
    w3_bf = w3_bf.at[:, :ACTION_DIM].set(w3.astype(jnp.bfloat16))
    bias_pack = jnp.zeros((BIAS_ROWS, HIDDEN), jnp.float32)
    bias_pack = bias_pack.at[0, :].set(b1)
    bias_pack = bias_pack.at[1, :].set(b2)
    bias_pack = bias_pack.at[2, :ACTION_DIM].set(b3)
    return w1_bf, w2_bf, w3_bf, bias_pack


def ref_forward_bf16(x, w1_bf, w2_bf, w3_bf, bias_pack):
    """Pure-JAX reference mirroring the kernel's bf16-input / f32-accumulate math."""
    b1 = bias_pack[0:1, :]
    b2 = bias_pack[1:2, :]
    b3 = bias_pack[2:3, :ACTION_DIM]
    h1 = jnp.maximum(jnp.dot(x.astype(jnp.bfloat16), w1_bf,
                             preferred_element_type=jnp.float32) + b1, 0.0)
    h2 = jnp.maximum(jnp.dot(h1.astype(jnp.bfloat16), w2_bf,
                             preferred_element_type=jnp.float32) + b2, 0.0)
    return jnp.dot(h2.astype(jnp.bfloat16), w3_bf[:, :ACTION_DIM],
                   preferred_element_type=jnp.float32) + b3


if __name__ == "__main__":
    key = jax.random.PRNGKey(0)
    k_x, k1, k2, k3 = jax.random.split(key, 4)

    w1, b1 = init_linear_params(k1, STATE_DIM, HIDDEN)
    w2, b2 = init_linear_params(k2, HIDDEN, HIDDEN)
    w3, b3 = init_linear_params(k3, HIDDEN, ACTION_DIM)
    w1_bf, w2_bf, w3_bf, bias_pack = pack_params(w1, b1, w2, b2, w3, b3)

    # --- small batch, default f32 output --------------------------------
    B = 8
    x = jax.random.normal(k_x, (B, STATE_DIM), jnp.float32)
    out = dqn_forward(x, w1_bf, w2_bf, w3_bf, bias_pack)
    out = jax.block_until_ready(out)
    assert out.shape == (B, ACTION_DIM)

    # Exact-path reference (bf16 inputs, f32 accumulation), tight tolerance.
    ref_bf = ref_forward_bf16(x, w1_bf, w2_bf, w3_bf, bias_pack)
    assert jnp.allclose(out, ref_bf, atol=2e-3, rtol=2e-3)

    # Full-f32 reference (original module semantics), loose tolerance for bf16 weights.
    ref_f32 = jnp.maximum(x @ w1 + b1[None, :], 0.0)
    ref_f32 = jnp.maximum(ref_f32 @ w2 + b2[None, :], 0.0)
    ref_f32 = ref_f32 @ w3 + b3[None, :]
    assert jnp.allclose(out, ref_f32, atol=5e-2, rtol=5e-2)

    # --- ragged batch (no wrapper pad; masked last-block stores) ---------
    B2 = 13
    x2 = jax.random.normal(jax.random.PRNGKey(1), (B2, STATE_DIM), jnp.float32)
    out2 = jax.block_until_ready(dqn_forward(x2, w1_bf, w2_bf, w3_bf, bias_pack))
    assert out2.shape == (B2, ACTION_DIM)
    ref2 = ref_forward_bf16(x2, w1_bf, w2_bf, w3_bf, bias_pack)
    assert jnp.allclose(out2, ref2, atol=2e-3, rtol=2e-3)

    # --- bf16 output path (HBM-saving variant for v6e/v7x) ---------------
    out_bf16 = jax.block_until_ready(
        dqn_forward(x, w1_bf, w2_bf, w3_bf, bias_pack, out_dtype=jnp.bfloat16))
    assert out_bf16.dtype == jnp.bfloat16
    assert jnp.allclose(out_bf16.astype(jnp.float32), ref_bf, atol=2e-2, rtol=2e-2)

    # --- untrimmed lane-dense output ------------------------------------
    out_full = jax.block_until_ready(
        dqn_forward(x, w1_bf, w2_bf, w3_bf, bias_pack, trim_output=False))
    assert out_full.shape == (B, OUT_PAD)
    assert jnp.allclose(out_full[:, :ACTION_DIM], ref_bf, atol=2e-3, rtol=2e-3)
    assert jnp.allclose(out_full[:, ACTION_DIM:], 0.0)

    print("KERNEL_OK")
</pallas_src>

<mosaic_0001>
module attributes {stable_mosaic.version = 11 : i64} {
  func.func @dqn_kernel(%arg0: i32, %arg1: memref<8x30xf32, #tpu.memory_space<vmem>>, %arg2: memref<30x256xbf16, #tpu.memory_space<vmem>>, %arg3: memref<256x256xbf16, #tpu.memory_space<vmem>>, %arg4: memref<256x128xbf16, #tpu.memory_space<vmem>>, %arg5: memref<8x256xf32, #tpu.memory_space<vmem>>, %arg6: memref<8x128xf32, #tpu.memory_space<vmem>>) attributes {dimension_semantics = [#tpu.dimension_semantics<parallel>], iteration_bounds = array<i64: 1>, scalar_prefetch = 0 : i64, scratch_operands = 0 : i64, tpu.core_type = #tpu.core_type<tc>, window_params = [{transform_indices = @transform_0, window_bounds = array<i64: 8, 30>}, {pipeline_mode = #tpu.pipeline_mode<synchronous>, transform_indices = @transform_1, window_bounds = array<i64: 30, 256>}, {pipeline_mode = #tpu.pipeline_mode<synchronous>, transform_indices = @transform_2, window_bounds = array<i64: 256, 256>}, {pipeline_mode = #tpu.pipeline_mode<synchronous>, transform_indices = @transform_3, window_bounds = array<i64: 256, 128>}, {pipeline_mode = #tpu.pipeline_mode<synchronous>, transform_indices = @transform_4, window_bounds = array<i64: 8, 256>}, {transform_indices = @transform_5, window_bounds = array<i64: 8, 128>}]} {
    %c0 = arith.constant 0 : index
    %c0_0 = arith.constant 0 : index
    %0 = vector.load %arg1[%c0, %c0_0] : memref<8x30xf32, #tpu.memory_space<vmem>>, vector<8x30xf32>
    %1 = arith.truncf %0 : vector<8x30xf32> to vector<8x30xbf16>
    %c0_1 = arith.constant 0 : index
    %c0_2 = arith.constant 0 : index
    %2 = vector.load %arg2[%c0_1, %c0_2] : memref<30x256xbf16, #tpu.memory_space<vmem>>, vector<30x256xbf16>
    %cst = arith.constant dense<0.000000e+00> : vector<8x256xf32>
    %3 = tpu.matmul %1, %2, %cst {dimension_numbers = #tpu.dot_dimension_numbers<[1], [0], [0], [1], [0, 0, 1, 1], [], []>} : vector<8x30xbf16>, vector<30x256xbf16>, vector<8x256xf32> -> vector<8x256xf32>
    %c0_3 = arith.constant 0 : index
    %c0_4 = arith.constant 0 : index
    %4 = vector.load %arg5[%c0_3, %c0_4] : memref<8x256xf32, #tpu.memory_space<vmem>>, vector<1x256xf32>
    %5 = vector.broadcast %4 : vector<1x256xf32> to vector<8x256xf32>
    %6 = arith.addf %3, %5 : vector<8x256xf32>
    %cst_5 = arith.constant 0.000000e+00 : f32
    %7 = vector.broadcast %cst_5 : f32 to vector<8x256xf32>
    %8 = arith.maximumf %6, %7 : vector<8x256xf32>
    %9 = arith.truncf %8 : vector<8x256xf32> to vector<8x256xbf16>
    %c0_6 = arith.constant 0 : index
    %c0_7 = arith.constant 0 : index
    %10 = vector.load %arg3[%c0_6, %c0_7] : memref<256x256xbf16, #tpu.memory_space<vmem>>, vector<256x256xbf16>
    %cst_8 = arith.constant dense<0.000000e+00> : vector<8x256xf32>
    %11 = tpu.matmul %9, %10, %cst_8 {dimension_numbers = #tpu.dot_dimension_numbers<[1], [0], [0], [1], [0, 0, 1, 1], [], []>} : vector<8x256xbf16>, vector<256x256xbf16>, vector<8x256xf32> -> vector<8x256xf32>
    %c1 = arith.constant 1 : index
    %c0_9 = arith.constant 0 : index
    %12 = vector.load %arg5[%c1, %c0_9] : memref<8x256xf32, #tpu.memory_space<vmem>>, vector<1x256xf32>
    %13 = vector.broadcast %12 : vector<1x256xf32> to vector<8x256xf32>
    %14 = arith.addf %11, %13 : vector<8x256xf32>
    %cst_10 = arith.constant 0.000000e+00 : f32
    %15 = vector.broadcast %cst_10 : f32 to vector<8x256xf32>
    %16 = arith.maximumf %14, %15 : vector<8x256xf32>
    %17 = arith.truncf %16 : vector<8x256xf32> to vector<8x256xbf16>
    %c0_11 = arith.constant 0 : index
    %c0_12 = arith.constant 0 : index
    %18 = vector.load %arg4[%c0_11, %c0_12] : memref<256x128xbf16, #tpu.memory_space<vmem>>, vector<256x128xbf16>
    %cst_13 = arith.constant dense<0.000000e+00> : vector<8x128xf32>
    %19 = tpu.matmul %17, %18, %cst_13 {dimension_numbers = #tpu.dot_dimension_numbers<[1], [0], [0], [1], [0, 0, 1, 1], [], []>} : vector<8x256xbf16>, vector<256x128xbf16>, vector<8x128xf32> -> vector<8x128xf32>
    %c2 = arith.constant 2 : index
    %c0_14 = arith.constant 0 : index
    %20 = vector.load %arg5[%c2, %c0_14] : memref<8x256xf32, #tpu.memory_space<vmem>>, vector<1x128xf32>
    %21 = vector.broadcast %20 : vector<1x128xf32> to vector<8x128xf32>
    %22 = arith.addf %19, %21 : vector<8x128xf32>
    %c0_15 = arith.constant 0 : index
    %c0_16 = arith.constant 0 : index
    %23 = vector.load %arg6[%c0_15, %c0_16] : memref<8x128xf32, #tpu.memory_space<vmem>>, vector<8x128xf32>
    tpu.vector_store %arg6[%c0_15, %c0_16], %22 {strides = array<i32>} : memref<8x128xf32, #tpu.memory_space<vmem>>, vector<8x128xf32>,
    return
  }
  func.func @transform_0(%arg0: i32) -> (i32, i32) {
    %c0_i32 = arith.constant 0 : i32
    %c0_i32_0 = arith.constant 0 : i32
    return %arg0, %c0_i32 : i32, i32
  }
  func.func @transform_1(%arg0: i32) -> (i32, i32) {
    %c0_i32 = arith.constant 0 : i32
    %c0_i32_0 = arith.constant 0 : i32
    %c0_i32_1 = arith.constant 0 : i32
    return %c0_i32, %c0_i32_0 : i32, i32
  }
  func.func @transform_2(%arg0: i32) -> (i32, i32) {
    %c0_i32 = arith.constant 0 : i32
    %c0_i32_0 = arith.constant 0 : i32
    %c0_i32_1 = arith.constant 0 : i32
    return %c0_i32, %c0_i32_0 : i32, i32
  }
  func.func @transform_3(%arg0: i32) -> (i32, i32) {
    %c0_i32 = arith.constant 0 : i32
    %c0_i32_0 = arith.constant 0 : i32
    %c0_i32_1 = arith.constant 0 : i32
    return %c0_i32, %c0_i32_0 : i32, i32
  }
  func.func @transform_4(%arg0: i32) -> (i32, i32) {
    %c0_i32 = arith.constant 0 : i32
    %c0_i32_0 = arith.constant 0 : i32
    %c0_i32_1 = arith.constant 0 : i32
    return %c0_i32, %c0_i32_0 : i32, i32
  }
  func.func @transform_5(%arg0: i32) -> (i32, i32) {
    %c0_i32 = arith.constant 0 : i32
    %c0_i32_0 = arith.constant 0 : i32
    return %arg0, %c0_i32 : i32, i32
  }
}

</mosaic_0001>

<bundles_post_ra>
// kernel: tpu_custom_call.1
= control target key start
LH: loop header
LB: loop body
LE: loop exit
PB: predicated region body
PF: predicated region fallthrough
CT: control target
= control target key end

     0   :  { %10 = vsyncpa [#allocation3], 0  ;;  %s1038_s0 = inlined_call_operand.hbm [shape: f32[8,30], index: 0, kind: input, shape index: {}]   ;;  %s1039_s1 = inlined_call_operand.hbm [shape: bf16[30,256], index: 1, kind: input, shape index: {}]   ;;  %s1040_s2 = inlined_call_operand.hbm [shape: bf16[256,256], index: 2, kind: input, shape index: {}]   ;;  %s1041_s3 = inlined_call_operand.hbm [shape: bf16[256,128], index: 3, kind: input, shape index: {}]   ;;  %s1042_s4 = inlined_call_operand.hbm [shape: f32[8,256], index: 4, kind: input, shape index: {}]   ;;  %s1043_s5 = inlined_call_operand.hbm [shape: f32[8,128], index: 5, kind: output, shape index: {}]  }
   0x1   :  { %11 = vsyncpa [#allocation6], 0 }
   0x2   :  { %12 = vsyncpa [#allocation9], 0 }
   0x3   :  { %13 = vsyncpa [#allocation4], 0  ;;  %s912_s18 = smov [#allocation5]   ;;  %s772_s22 = scalar_lea.hbm %s1039_s1, 512 }
   0x4   :  { %s29_s19 = sshll.u32 %s912_s18, 4  ;;  %p773_p0 = scmp.ne.s32.totalorder %s1039_s1, %s772_s22  ;;  %s30_s19 = int_to_ptr.vmem [resolvable:$true] %s29_s19 }
   0x5   :  { %p776_p1 = scmp.lt.u32.totalorder %s772_s22, %s1039_s1 }
   0x7   :  { %p778_p2 = pnand %p776_p1, %p773_p0 }
   0x9   :  { %781 = shalt.err (!%p778_p2)
}
   0xa   :  { %s782_s27 = scalar_lea.vmem %s30_s19, 512  ;;  %p787_p4 = scmp.lt.s32.totalorder %s30_s19, %s30_s19 }
   0xb   :  { %p783_p3 = scmp.ne.s32.totalorder %s30_s19, %s782_s27  ;;  %p788_p5 = scmp.lt.s32.totalorder %s782_s27, %s782_s27 }
   0xd   :  { %p789_p6 = por %p788_p5, %p787_p4 }
   0xf   :  { %p790_p7 = pnand %p789_p6, %p783_p3 }
  0x11   :  { %793 = shalt.err (!%p790_p7)
}
  0x12   :  { %s913_s28 = smov 128   ;;  %s914_s29 = smov 8  }
  0x13   :  { %35 = dma.hbm_to_vmem [thread:$0]  %s1039_s1, 512, %s30_s19, [#allocation6], %s913_s28, %s913_s28, %s914_s29  }
  0x14   :  { %s915_s7 = smov [#allocation8]   ;;  %s794_s11 = scalar_lea.hbm %s1041_s3, 2048 }
  0x15   :  { %s53_s8 = sshll.u32 %s915_s7, 4  ;;  %p795_p8 = scmp.ne.s32.totalorder %s1041_s3, %s794_s11  ;;  %s54_s8 = int_to_ptr.vmem [resolvable:$true] %s53_s8 }
  0x16   :  { %p798_p9 = scmp.lt.u32.totalorder %s794_s11, %s1041_s3 }
  0x18   :  { %p800_p10 = pnand %p798_p9, %p795_p8 }
  0x1a   :  { %803 = shalt.err (!%p800_p10)
}
  0x1b   :  { %s804_s16 = scalar_lea.vmem %s54_s8, 2048  ;;  %p809_p12 = scmp.lt.s32.totalorder %s54_s8, %s54_s8 }
  0x1c   :  { %p805_p11 = scmp.ne.s32.totalorder %s54_s8, %s804_s16  ;;  %p810_p13 = scmp.lt.s32.totalorder %s804_s16, %s804_s16 }
  0x1e   :  { %p811_p0 = por %p810_p13, %p809_p12 }
  0x20   :  { %p812_p1 = pnand %p811_p0, %p805_p11 }
  0x22   :  { %815 = shalt.err (!%p812_p1)
}
  0x23   :  { %s916_s1 = smov 64   ;;  %s917_s17 = smov 4  }
  0x24   :  { %59 = dma.hbm_to_vmem [thread:$0]  %s1041_s3, 2048, %s54_s8, [#allocation9], %s916_s1, %s916_s1, %s917_s17  }
  0x25   :  { %s918_s20 = smov [#allocation2]   ;;  %s919_s22 = smov [#allocation7]  }
  0x26   :  { %s20_s21 = sshll.u32 %s918_s20, 4  ;;  %s41_s23 = sshll.u32 %s919_s22, 4  ;;  %s21_s21 = int_to_ptr.vmem [resolvable:$true] %s20_s21  ;;  %s980_s23 = int_to_ptr.vmem [resolvable:$true] %s41_s23 }
  0x27   :  { %s816_s26 = scalar_lea.hbm %s1038_s0, 128 }
  0x28   :  { %p817_p2 = scmp.ne.s32.totalorder %s1038_s0, %s816_s26  ;;  %p820_p3 = scmp.lt.u32.totalorder %s816_s26, %s1038_s0 }
  0x2a   :  { %p822_p4 = pnand %p820_p3, %p817_p2 }
  0x2c   :  { %825 = shalt.err (!%p822_p4)
}
  0x2d   :  { %s826_s3 = scalar_lea.vmem %s21_s21, 128  ;;  %p831_p6 = scmp.lt.s32.totalorder %s21_s21, %s21_s21 }
  0x2e   :  { %p827_p5 = scmp.ne.s32.totalorder %s21_s21, %s826_s3  ;;  %p832_p7 = scmp.lt.s32.totalorder %s826_s3, %s826_s3 }
  0x30   :  { %p833_p8 = por %p832_p7, %p831_p6 }
  0x32   :  { %p834_p9 = pnand %p833_p8, %p827_p5 }
  0x34   :  { %837 = shalt.err (!%p834_p9)
}
  0x35   :  { %23 = dma.hbm_to_vmem [thread:$0]  %s1038_s0, 128, %s21_s21, [#allocation3]  }
  0x36   :  { %s838_s12 = scalar_lea.hbm %s1040_s2, 4096 }
  0x37   :  { %p839_p10 = scmp.ne.s32.totalorder %s1040_s2, %s838_s12  ;;  %p842_p11 = scmp.lt.u32.totalorder %s838_s12, %s1040_s2 }
  0x39   :  { %p844_p12 = pnand %p842_p11, %p839_p10 }
  0x3b   :  { %847 = shalt.err (!%p844_p12)
}
  0x3c   :  { %s848_s1 = scalar_lea.vmem %s980_s23, 4096  ;;  %p853_p0 = scmp.lt.s32.totalorder %s980_s23, %s980_s23 }
  0x3d   :  { %p849_p13 = scmp.ne.s32.totalorder %s980_s23, %s848_s1  ;;  %p854_p1 = scmp.lt.s32.totalorder %s848_s1, %s848_s1 }
  0x3f   :  { %p855_p2 = por %p854_p1, %p853_p0 }
  0x41   :  { %p856_p3 = pnand %p855_p2, %p849_p13 }
  0x43   :  { %859 = shalt.err (!%p856_p3)
}
  0x44   :  { %47 = dma.hbm_to_vmem [thread:$0]  %s1040_s2, 4096, %s980_s23, [#allocation6], %s913_s28, %s913_s28, %s914_s29  }
  0x45   :  { %s920_s18 = smov [#allocation10]   ;;  %s860_s22 = scalar_lea.hbm %s1042_s4, 256 }
  0x46   :  { %s66_s19 = sshll.u32 %s920_s18, 4  ;;  %p861_p4 = scmp.ne.s32.totalorder %s1042_s4, %s860_s22  ;;  %s67_s19 = int_to_ptr.vmem [resolvable:$true] %s66_s19 }
  0x47   :  { %p864_p5 = scmp.lt.u32.totalorder %s860_s22, %s1042_s4 }
  0x49   :  { %p866_p6 = pnand %p864_p5, %p861_p4 }
  0x4b   :  { %869 = shalt.err (!%p866_p6)
}
  0x4c   :  { %s870_s30 = scalar_lea.vmem %s67_s19, 256  ;;  %p875_p8 = scmp.lt.s32.totalorder %s67_s19, %s67_s19 }
  0x4d   :  { %p871_p7 = scmp.ne.s32.totalorder %s67_s19, %s870_s30  ;;  %p876_p9 = scmp.lt.s32.totalorder %s870_s30, %s870_s30 }
  0x4f   :  { %p877_p10 = por %p876_p9, %p875_p8 }
  0x51   :  { %p878_p11 = pnand %p877_p10, %p871_p7 }
  0x53   :  { %881 = shalt.err (!%p878_p11)
}
  0x54   :  { %69 = dma.hbm_to_vmem [thread:$0]  %s1042_s4, 256, %s67_s19, [#allocation9]  }
  0x55   :  { %904 = dma.done.wait [#allocation3], 128  }
  0x56   :  { %905 = vsyncadd [#allocation3], 4294967168 }
  0x57   :  { %906 = dma.done.wait [#allocation6], 4608  }
  0x58   :  { %907 = vsyncadd [#allocation6], 4294962688 }
  0x59   :  { %908 = dma.done.wait [#allocation9], 2304  }
  0x5a   :  { %909 = vsyncadd [#allocation9], 4294964992  ;;  %v921_v0 = vmov 0   ;;  %v702_v1 = vld [vmem:[#allocation5 + $0x4] ss:$8 sps:$4 sm:$0xff]   ;;  %vm126_vm0 = vcmask 1046528   ;;  %v94_v52 = vlaneseq }
  0x5b   :  { %165 = vmatprep.mubr.bf16.mxu0 %v921_v0  ;;  %v704_v2 = vld [vmem:[#allocation5] ss:$8 sps:$4 sm:$0xff]   ;;  %133 = vmatprep.subr.bf16.mxu0 %v702_v1  ;;  %v705_v3 = vld [vmem:[#allocation5 + $0x14] ss:$8 sps:$4 sm:$0x7f]   ;;  %vm122_vm1 = vcmask 244736  }
  0x5c   :  { %v707_v4 = vld [vmem:[#allocation5 + $0x10] ss:$8 sps:$4 sm:$0x7f]   ;;  %134 = vmatpush1.bf16.msra.mxu0 %v704_v2  ;;  %v708_v7 = vld [vmem:[#allocation7 + $0x4] ss:$8 sps:$4 sm:$0xff]   ;;  %v95_v53 = vshrl.u32 %v94_v52, 7 }
  0x5d   :  { %v86_v5 = vld [vmem:[#allocation2] sm:$0xff]  ;;  %619 = vmatprep.subr.msk.bf16.mxu0 %vm126_vm0, %v705_v3  ;;  %v128_v6 = vsel %vm126_vm0, %v707_v4, 0  ;;  %v710_v8 = vld [vmem:[#allocation7] ss:$8 sps:$4 sm:$0xff]   ;;  %383 = vmatprep.subr.bf16.mxu1 %v708_v7  ;;  %v714_v12 = vld [vmem:[#allocation7 + $0x24] ss:$8 sps:$4 sm:$0xff]  }
  0x5e   :  { %v711_v9 = vld [vmem:[#allocation7 + $0x14] ss:$8 sps:$4 sm:$0xff]   ;;  %v87_v10 = vpack.c.bf16 %v86_v5, %v86_v5  ;;  %384 = vmatpush1.bf16.msra.mxu1 %v710_v8  ;;  %v713_v11 = vld [vmem:[#allocation7 + $0x10] ss:$8 sps:$4 sm:$0xff]   ;;  %v716_v13 = vld [vmem:[#allocation7 + $0x20] ss:$8 sps:$4 sm:$0xff]  }
  0x5f   :  { %385 = vmatprep.subr.bf16.mxu1 %v711_v9  ;;  %v717_v14 = vld [vmem:[#allocation7 + $0x34] ss:$8 sps:$4 sm:$0xff]   ;;  %v719_v15 = vld [vmem:[#allocation7 + $0x30] ss:$8 sps:$4 sm:$0xff]   ;;  %v720_v16 = vld [vmem:[#allocation7 + $0x44] ss:$8 sps:$4 sm:$0xff]  }
  0x60   :  { %136 = vmatpush1.bf16.msra.mxu0 %v128_v6  ;;  %v722_v17 = vld [vmem:[#allocation7 + $0x40] ss:$8 sps:$4 sm:$0xff]   ;;  %v723_v18 = vld [vmem:[#allocation7 + $0x54] ss:$8 sps:$4 sm:$0xff]   ;;  %v725_v19 = vld [vmem:[#allocation7 + $0x50] ss:$8 sps:$4 sm:$0xff]  }
  0x61   :  { %v726_v20 = vld [vmem:[#allocation7 + $0x64] ss:$8 sps:$4 sm:$0xff]   ;;  %v728_v21 = vld [vmem:[#allocation7 + $0x60] ss:$8 sps:$4 sm:$0xff]   ;;  %v729_v22 = vld [vmem:[#allocation7 + $0x74] ss:$8 sps:$4 sm:$0xff]  }
  0x62   :  { %386 = vmatpush1.bf16.msra.mxu1 %v713_v11  ;;  %v731_v23 = vld [vmem:[#allocation7 + $0x70] ss:$8 sps:$4 sm:$0xff]   ;;  %v732_v24 = vld [vmem:[#allocation7 + $0x84] ss:$8 sps:$4 sm:$0xff]   ;;  %v734_v25 = vld [vmem:[#allocation7 + $0x80] ss:$8 sps:$4 sm:$0xff]  }
  0x63   :  { %620 = vmatmul.mubr.msk.bf16.vlgmr.msra.gmra.mrb[0].mxu0 %vm122_vm1, %v87_v10  ;;  %387 = vmatprep.subr.bf16.mxu1 %v714_v12  ;;  %v735_v26 = vld [vmem:[#allocation7 + $0x94] ss:$8 sps:$4 sm:$0xff]   ;;  %v737_v27 = vld [vmem:[#allocation7 + $0x90] ss:$8 sps:$4 sm:$0xff]   ;;  %v738_v28 = vld [vmem:[#allocation7 + $0xa4] ss:$8 sps:$4 sm:$0xff]  }
  0x64   :  { %v740_v29 = vld [vmem:[#allocation7 + $0xa0] ss:$8 sps:$4 sm:$0xff]   ;;  %v741_v30 = vld [vmem:[#allocation7 + $0xb4] ss:$8 sps:$4 sm:$0xff]   ;;  %v743_v31 = vld [vmem:[#allocation7 + $0xb0] ss:$8 sps:$4 sm:$0xff]  }
  0x65   :  { %v744_v32 = vld [vmem:[#allocation7 + $0xc4] ss:$8 sps:$4 sm:$0xff]   ;;  %v746_v33 = vld [vmem:[#allocation7 + $0xc0] ss:$8 sps:$4 sm:$0xff]   ;;  %v747_v34 = vld [vmem:[#allocation7 + $0xd4] ss:$8 sps:$4 sm:$0xff]  }
  0x66   :  { %388 = vmatpush1.bf16.msra.mxu1 %v716_v13  ;;  %v749_v35 = vld [vmem:[#allocation7 + $0xd0] ss:$8 sps:$4 sm:$0xff]   ;;  %v750_v36 = vld [vmem:[#allocation7 + $0xe4] ss:$8 sps:$4 sm:$0xff]   ;;  %v752_v37 = vld [vmem:[#allocation7 + $0xe0] ss:$8 sps:$4 sm:$0xff]  }
  0x67   :  { %389 = vmatprep.subr.bf16.mxu1 %v717_v14  ;;  %v753_v38 = vld [vmem:[#allocation7 + $0xf4] ss:$8 sps:$4 sm:$0xff]   ;;  %v755_v39 = vld [vmem:[#allocation7 + $0xf0] ss:$8 sps:$4 sm:$0xff]   ;;  %v756_v40 = vld [vmem:[#allocation8 + $0x40] sm:$0xff]   ;;  %v96_v54 = vsub.s32 0, %v95_v53 }
  0x68   :  { %v757_v41 = vld [vmem:[#allocation8] sm:$0xff]   ;;  %v758_v42 = vld [vmem:[#allocation8 + $0x48] sm:$0xff]   ;;  %669 = vmatprep.subr.bf16.mxu0 %v756_v40  ;;  %v760_v44 = vld [vmem:[#allocation8 + $0x50] sm:$0xff]   ;;  %v100_v56 = vsub.s32 1, %v95_v53  ;;  %s922_s4 = smov [#allocation11]  }
  0x69   :  { %670 = vmatpush3.bf16.msra.mxu0 %v757_v41  ;;  %v759_v43 = vld [vmem:[#allocation8 + $0x8] sm:$0xff]   ;;  %v761_v45 = vld [vmem:[#allocation8 + $0x10] sm:$0xff]   ;;  %v762_v46 = vld [vmem:[#allocation8 + $0x58] sm:$0xff]   ;;  %s604_s29 = sshll.u32 %s922_s4, 4  ;;  %s605_s29 = int_to_ptr.vmem [resolvable:$true] %s604_s29 }
  0x6a   :  { %390 = vmatpush1.bf16.msra.mxu1 %v719_v15  ;;  %671 = vmatprep.subr.bf16.mxu0 %v758_v42  ;;  %v763_v47 = vld [vmem:[#allocation8 + $0x18] sm:$0xff]   ;;  %v764_v48 = vld [vmem:[#allocation8 + $0x60] sm:$0xff]   ;;  %v766_v50 = vld [vmem:[#allocation8 + $0x68] sm:$0xff]   ;;  %s882_s23 = scalar_lea.vmem %s605_s29, 128  ;;  %p887_p13 = scmp.lt.s32.totalorder %s605_s29, %s605_s29 }
  0x6b   :  { %391 = vmatprep.subr.bf16.mxu1 %v720_v16  ;;  %v765_v49 = vld [vmem:[#allocation8 + $0x20] sm:$0xff]   ;;  %v767_v51 = vld [vmem:[#allocation8 + $0x28] sm:$0xff]   ;;  %v768_v5 = vld [vmem:[#allocation8 + $0x70] sm:$0xff]   ;;  %p883_p12 = scmp.ne.s32.totalorder %s605_s29, %s882_s23  ;;  %p888_p0 = scmp.lt.s32.totalorder %s882_s23, %s882_s23 }
  0x6c   :  { %v92_v55 = vld [vmem:[#allocation10] ss:$8 sm:$0x3]  ;;  %v769_v6 = vld [vmem:[#allocation8 + $0x30] sm:$0xff]   ;;  %v770_v7 = vld [vmem:[#allocation8 + $0x78] sm:$0xff]  }
  0x6d   :  { %672 = vmatpush3.bf16.msra.mxu0 %v759_v43  ;;  %v97_v57 = vrot.slane %v92_v55, %v96_v54  ;;  %v101_v58 = vrot.slane %v92_v55, %v100_v56  ;;  %v771_v8 = vld [vmem:[#allocation8 + $0x38] sm:$0xff]   ;;  %v211_v9 = vld [vmem:[#allocation10 + $0x1] ss:$8 sm:$0x3]  ;;  %p889_p1 = por %p888_p0, %p887_p13 }
  0x6e   :  { %392 = vmatpush1.bf16.msra.mxu1 %v722_v17  ;;  %673 = vmatprep.subr.bf16.mxu0 %v760_v44  ;;  %v216_v10 = vrot.slane %v211_v9, %v96_v54  ;;  %v220_v11 = vrot.slane %v211_v9, %v100_v56 }
  0x6f   :  { %393 = vmatprep.subr.bf16.mxu1 %v723_v18  ;;  %p890_p2 = pnand %p889_p1, %p883_p12 }
  0x71   :  { %674 = vmatpush3.bf16.msra.mxu0 %v761_v45 }
  0x72   :  { %394 = vmatpush1.bf16.msra.mxu1 %v725_v19  ;;  %675 = vmatprep.subr.bf16.mxu0 %v762_v46 }
  0x73   :  { %395 = vmatprep.subr.bf16.mxu1 %v726_v20 }
  0x75   :  { %676 = vmatpush3.bf16.msra.mxu0 %v763_v47 }
  0x76   :  { %396 = vmatpush1.bf16.msra.mxu1 %v728_v21  ;;  %677 = vmatprep.subr.bf16.mxu0 %v764_v48 }
  0x77   :  { %397 = vmatprep.subr.bf16.mxu1 %v729_v22 }
  0x79   :  { %678 = vmatpush3.bf16.msra.mxu0 %v765_v49 }
  0x7a   :  { %398 = vmatpush1.bf16.msra.mxu1 %v731_v23  ;;  %679 = vmatprep.subr.bf16.mxu0 %v766_v50  ;;  %v460_v23 = vld [vmem:[#allocation10 + $0x2] ss:$0 sm:$0xff] }
  0x7b   :  { %399 = vmatprep.subr.bf16.mxu1 %v732_v24 }
  0x7d   :  { %680 = vmatpush3.bf16.msra.mxu0 %v767_v51 }
  0x7e   :  { %400 = vmatpush1.bf16.msra.mxu1 %v734_v25  ;;  %681 = vmatprep.subr.bf16.mxu0 %v768_v5 }
  0x7f   :  { %401 = vmatprep.subr.bf16.mxu1 %v735_v26 }
  0x81   :  { %682 = vmatpush3.bf16.msra.mxu0 %v769_v6 }
  0x82   :  { %402 = vmatpush1.bf16.msra.mxu1 %v737_v27  ;;  %683 = vmatprep.subr.bf16.mxu0 %v770_v7 }
  0x83   :  { %403 = vmatprep.subr.bf16.mxu1 %v738_v28 }
  0x85   :  { %684 = vmatpush3.bf16.msra.mxu0 %v771_v8 }
  0x86   :  { %404 = vmatpush1.bf16.msra.mxu1 %v740_v29 }
  0x87   :  { %405 = vmatprep.subr.bf16.mxu1 %v741_v30 }
  0x8a   :  { %406 = vmatpush1.bf16.msra.mxu1 %v743_v31 }
  0x8b   :  { %407 = vmatprep.subr.bf16.mxu1 %v744_v32 }
  0x8e   :  { %408 = vmatpush1.bf16.msra.mxu1 %v746_v33 }
  0x8f   :  { %409 = vmatprep.subr.bf16.mxu1 %v747_v34 }
  0x92   :  { %410 = vmatpush1.bf16.msra.mxu1 %v749_v35 }
  0x93   :  { %411 = vmatprep.subr.bf16.mxu1 %v750_v36 }
  0x96   :  { %412 = vmatpush1.bf16.msra.mxu1 %v752_v37 }
  0x97   :  { %413 = vmatprep.subr.bf16.mxu1 %v753_v38 }
  0x9a   :  { %414 = vmatpush1.bf16.msra.mxu1 %v755_v39 }
 0x136   :  { %v167_v59 = vpop.f32.mrb[0].mxu0 }
 0x137   :  { %v168_v60 = vadd.f32 %v167_v59, %v97_v57  ;;  %v169_v61 = vpop.f32.mrb[1].mxu0 }
 0x138   :  { %v170_v62 = vadd.f32 %v169_v61, %v101_v58  ;;  %v171_v63 = vpop.f32.mrb[2].mxu0 }
 0x139   :  { %v174_v0 = vmax.f32 %v168_v60, 0.0  ;;  %v172_v1 = vpop.f32.mrb[3].mxu0 }
 0x13a   :  { %v175_v2 = vmax.f32 %v170_v62, 0.0 }
 0x13b   :  { %v176_v4 = vpack.c.bf16 %v174_v0, %v174_v0 }
 0x13c   :  { %v177_v3 = vpack.c.bf16 %v175_v2, %v175_v2 }
 0x13e   :  { %415 = vmatprep.mubr.bf16.mxu1 %v177_v3 }
 0x13f   :  { %416 = vmatmul.mubr.bf16.vlgmr.msra.gmra.mrb[0].mxu1 %v176_v4 }
 0x212   :  { %v417_v12 = vpop.f32.mrb[0].mxu1 }
 0x213   :  { %v418_v13 = vadd.f32 %v417_v12, %v216_v10  ;;  %v419_v14 = vpop.f32.mrb[1].mxu1 }
 0x214   :  { %v420_v15 = vadd.f32 %v419_v14, %v220_v11  ;;  %v421_v16 = vpop.f32.mrb[2].mxu1 }
 0x215   :  { %v424_v17 = vmax.f32 %v418_v13, 0.0  ;;  %v422_v18 = vpop.f32.mrb[3].mxu1 }
 0x216   :  { %v425_v19 = vmax.f32 %v420_v15, 0.0 }
 0x217   :  { %v426_v21 = vpack.c.bf16 %v424_v17, %v424_v17 }
 0x218   :  { %v427_v20 = vpack.c.bf16 %v425_v19, %v425_v19 }
 0x21a   :  { %589 = vmatprep.mubr.bf16.mxu0 %v427_v20 }
 0x21b   :  { %590 = vmatmul.mubr.bf16.vlgmr.msra.gmra.mrb[4].mxu0 %v426_v21 }
 0x2ee   :  { %v685_v22 = vpop.f32.mrb[4].mxu0 }
 0x2ef   :  { %v686_v24 = vpop.f32.mrb[5].mxu0 }
 0x2f0   :  { %v687_v25 = vadd.f32 %v686_v24, %v685_v22  ;;  %v688_v26 = vpop.f32.mrb[6].mxu0 }
 0x2f1   :  { %v689_v27 = vpop.f32.mrb[7].mxu0 }
 0x2f2   :  { %v592_v28 = vadd.f32 %v687_v25, %v460_v23 }
 0x2f4   :  { %597 = vst [vmem:[#allocation11] sm:$0xff] %v592_v28 }
 0x2f5   :  { %893 = shalt.err (!%p890_p2)
}
 0x2f6   :  { %s894_s3 = scalar_lea.hbm %s1043_s5, 128 }
 0x2f7   :  { %p895_p3 = scmp.ne.s32.totalorder %s1043_s5, %s894_s3  ;;  %p898_p4 = scmp.lt.u32.totalorder %s894_s3, %s1043_s5 }
 0x2f9   :  { %p900_p5 = pnand %p898_p4, %p895_p3 }
 0x2fb   :  { %903 = shalt.err (!%p900_p5)
}
 0x2fc   :  { %607 = dma.vmem_to_hbm [thread:$0]  %s605_s29, 128, %s1043_s5, [#allocation4]  }
 0x2fd   :  { %910 = dma.done.wait [#allocation4], 128  }
 0x2fe   :  { %911 = vsyncadd [#allocation4], 4294967168 }
 0x2ff   :  { %611 = vsyncpa [#allocation3], 1 }
 0x300   :  { %612 = vsyncpa [#allocation6], 1 }
 0x301   :  { %613 = vsyncpa [#allocation9], 1 }
 0x302   :  { %614 = vsyncpa [#allocation4], 1 }

</bundles_post_ra>
